<compile_context>
chip_gen: v7x
topology: tpu7x:2x2x1
jax: 0.10.0
libtpu: 0.0.40
codegen_flags: <defaults>
</compile_context>

<pallas_src>
import jax
import jax.numpy as jnp
from jax.experimental import pallas as pl
from jax.experimental.pallas import tpu as pltpu

DIL = 3      # dilation (== spatial padding) of dilation_conv(..., dilation=3)
EPS = 1e-5   # nn.BatchNorm2d default eps


def _round_up(x, m):
    return (x + m - 1) // m * m


def _make_kernel(N, C, H, W, F, PP):
    """Build the kernel closure for static shape parameters.

    Layout inside the kernel (all lane-dense, last dim = flattened H*W):
      x_ref  : (N, C, H*W)   pure reshape of the NCHW input
      w*_ref : (C, 9*C)      (c_out, tap*C + c_in), tap = ky*3 + kx
      g*/b*  : (C, 1)
      o_ref  : (N, C, H*W)
      pad_ref: (N, C, PP)    per-image flattened plane with zero borders:
               lanes [0, F) zero, [F, F+H*W) activations, [F+H*W, PP) zero.
               F and PP are 128-multiples, so interior stores are aligned.
    Tap (dy, dx) of the dilated 3x3 conv is the lane slice at offset
    F + dy*W + dx; the H boundary is handled by the zero borders, the W
    boundary by a per-column mask (only needed for dx != 0).
    """
    Xv = H * W
    M = N * Xv
    inv_m = 1.0 / M

    def kernel(x_ref, w1_ref, w2_ref, g1_ref, b1_ref, g2_ref, b2_ref,
               o_ref, pad_ref):
        # ---- column masks for the +/-DIL horizontal taps (built once) ----
        lane = jax.lax.broadcasted_iota(jnp.int32, (1, Xv), 1)
        wcol = (lane & (W - 1)) if (W & (W - 1)) == 0 else (lane % W)
        keep_left = wcol >= DIL            # tap with dx = -DIL
        keep_right = wcol < (W - DIL)      # tap with dx = +DIL

        # ---- zero the two aligned pad borders of the scratch (once) ----
        pad_ref[:, :, :F] = jnp.zeros((N, C, F), jnp.float32)
        pad_ref[:, :, F + Xv:] = jnp.zeros((N, C, PP - F - Xv), jnp.float32)

        def im2col(n):
            # (9C, Xv) patch matrix for image n: 9 full-lane (C, Xv) slices of
            # the padded plane, stacked along sublanes (aligned 8-row slabs).
            plane = pad_ref[n, :, :]                       # (C, PP), ~few vregs
            taps = []
            for ky in range(3):
                dy = (ky - 1) * DIL
                for kx in range(3):
                    dx = (kx - 1) * DIL
                    a = F + dy * W + dx
                    t = plane[:, a:a + Xv]                 # (C, Xv) lane-dense
                    if dx > 0:
                        t = jnp.where(keep_right, t, 0.0)
                    elif dx < 0:
                        t = jnp.where(keep_left, t, 0.0)
                    taps.append(t)
            return jnp.concatenate(taps, axis=0)           # (9C, Xv)

        def conv(w_ref):
            # One (C, 9C) x (9C, Xv) MXU matmul per image; lane-dense output.
            wmat = w_ref[...]
            return [jnp.dot(wmat, im2col(n), preferred_element_type=jnp.float32)
                    for n in range(N)]                     # N x (C, Xv)

        def bn(acc, g_ref, b_ref):
            # Training-mode batch stats over all N*H*W positions per channel,
            # two-pass (centered) variance.  All reductions are lane (axis=1)
            # reductions on (C, Xv) slabs.
            s = acc[0].sum(axis=1, keepdims=True)
            for n in range(1, N):
                s = s + acc[n].sum(axis=1, keepdims=True)
            mean = s * inv_m                               # (C, 1)
            cen = [a - mean for a in acc]
            q = (cen[0] * cen[0]).sum(axis=1, keepdims=True)
            for n in range(1, N):
                q = q + (cen[n] * cen[n]).sum(axis=1, keepdims=True)
            var = q * inv_m                                # (C, 1), biased
            scale = g_ref[...] * jax.lax.rsqrt(var + EPS)  # (C, 1)
            bias = b_ref[...]
            return [c * scale + bias for c in cen]         # N x (C, Xv)

        # ---- conv1 -> bn1 -> relu, written back into the scratch interior ----
        pad_ref[:, :, F:F + Xv] = x_ref[...]               # aligned full-lane store
        out1 = bn(conv(w1_ref), g1_ref, b1_ref)
        for n in range(N):
            pad_ref[n, :, F:F + Xv] = jnp.maximum(out1[n], 0.0)

        # ---- conv2 -> bn2 -> + residual -> relu ----
        out2 = bn(conv(w2_ref), g2_ref, b2_ref)
        for n in range(N):
            o_ref[n, :, :] = jnp.maximum(out2[n] + x_ref[n, :, :], 0.0)

    return kernel


def residual_block_dilated(x_nchw, w1, w2, g1, b1, g2, b2):
    """x_nchw: (N, C, H, W) f32. w1/w2 in HWIO layout (3, 3, Cin, Cout)."""
    N, C, H, W = x_nchw.shape
    Xv = H * W
    # Front pad must cover the most-negative flattened tap offset
    # (DIL*W + DIL); round both borders to lane-tile multiples so the interior
    # stores stay 128-lane aligned.
    F = _round_up(DIL * W + DIL, 128)
    PP = _round_up(F + Xv + DIL * W + DIL, 128)

    x_r = x_nchw.reshape(N, C, Xv).astype(jnp.float32)           # pure reshape
    w1_cm = w1.astype(jnp.float32).reshape(9 * C, C).T            # (C, 9C), tiny
    w2_cm = w2.astype(jnp.float32).reshape(9 * C, C).T

    vspec = pl.BlockSpec(memory_space=pltpu.MemorySpace.VMEM)
    out = pl.pallas_call(
        _make_kernel(N, C, H, W, F, PP),
        out_shape=jax.ShapeDtypeStruct((N, C, Xv), jnp.float32),
        in_specs=[vspec] * 7,
        out_specs=vspec,
        scratch_shapes=[pltpu.VMEM((N, C, PP), jnp.float32)],
    )(x_r, w1_cm, w2_cm,
      g1.reshape(C, 1).astype(jnp.float32), b1.reshape(C, 1).astype(jnp.float32),
      g2.reshape(C, 1).astype(jnp.float32), b2.reshape(C, 1).astype(jnp.float32))

    return out.reshape(N, C, H, W)                                # pure reshape


# ---------------- pure-JAX reference (for correctness check) ----------------
def _ref_forward(x_nchw, w1, w2, g1, b1, g2, b2):
    x = jnp.transpose(x_nchw, (0, 2, 3, 1)).astype(jnp.float32)

    def conv(inp, w):
        return jax.lax.conv_general_dilated(
            inp, w, window_strides=(1, 1),
            padding=((DIL, DIL), (DIL, DIL)), rhs_dilation=(DIL, DIL),
            dimension_numbers=("NHWC", "HWIO", "NHWC"))

    def bn(inp, g, b):
        m = inp.mean(axis=(0, 1, 2), keepdims=True)
        v = ((inp - m) ** 2).mean(axis=(0, 1, 2), keepdims=True)
        return (inp - m) * jax.lax.rsqrt(v + EPS) * g + b

    o1 = jnp.maximum(bn(conv(x, w1), g1, b1), 0.0)
    o2 = bn(conv(o1, w2), g2, b2)
    out = jnp.maximum(o2 + x, 0.0)
    return jnp.transpose(out, (0, 3, 1, 2))


if __name__ == "__main__":
    key = jax.random.PRNGKey(0)
    N, C, H, W = 2, 8, 16, 16          # in_channels == out_channels (no downsample)
    ks = jax.random.split(key, 7)

    x = jax.random.normal(ks[0], (N, C, H, W), jnp.float32)
    std = (2.0 / (9 * C)) ** 0.5       # kaiming-style deterministic init
    w1 = jax.random.normal(ks[1], (3, 3, C, C), jnp.float32) * std
    w2 = jax.random.normal(ks[2], (3, 3, C, C), jnp.float32) * std
    g1 = 1.0 + 0.1 * jax.random.normal(ks[3], (C,), jnp.float32)
    b1 = 0.1 * jax.random.normal(ks[4], (C,), jnp.float32)
    g2 = 1.0 + 0.1 * jax.random.normal(ks[5], (C,), jnp.float32)
    b2 = 0.1 * jax.random.normal(ks[6], (C,), jnp.float32)

    out = jax.block_until_ready(residual_block_dilated(x, w1, w2, g1, b1, g2, b2))
    ref = _ref_forward(x, w1, w2, g1, b1, g2, b2)
    assert out.shape == (N, C, H, W), out.shape
    assert bool(jnp.allclose(out, ref, rtol=1e-4, atol=1e-4)), \
        float(jnp.max(jnp.abs(out - ref)))
    print("KERNEL_OK")
</pallas_src>

<mosaic_0001>
module attributes {stable_mosaic.version = 11 : i64} {
  func.func @kernel(%arg0: memref<2x8x256xf32, #tpu.memory_space<vmem>>, %arg1: memref<8x72xf32, #tpu.memory_space<vmem>>, %arg2: memref<8x72xf32, #tpu.memory_space<vmem>>, %arg3: memref<8x1xf32, #tpu.memory_space<vmem>>, %arg4: memref<8x1xf32, #tpu.memory_space<vmem>>, %arg5: memref<8x1xf32, #tpu.memory_space<vmem>>, %arg6: memref<8x1xf32, #tpu.memory_space<vmem>>, %arg7: memref<2x8x256xf32, #tpu.memory_space<vmem>>, %arg8: memref<2x8x512xf32, #tpu.memory_space<vmem>>) attributes {dimension_semantics = [], scalar_prefetch = 0 : i64, scratch_operands = 1 : i64, tpu.core_type = #tpu.core_type<tc>} {
    %0 = tpu.iota {dimensions = array<i32: 1>} : vector<1x256xi32>
    %c15_i32 = arith.constant 15 : i32
    %1 = vector.broadcast %c15_i32 : i32 to vector<1x256xi32>
    %2 = arith.andi %0, %1 : vector<1x256xi32>
    %c3_i32 = arith.constant 3 : i32
    %3 = vector.broadcast %c3_i32 : i32 to vector<1x256xi32>
    %4 = arith.cmpi sge, %2, %3 : vector<1x256xi32>
    %c13_i32 = arith.constant 13 : i32
    %5 = vector.broadcast %c13_i32 : i32 to vector<1x256xi32>
    %6 = arith.cmpi slt, %2, %5 : vector<1x256xi32>
    %cst = arith.constant 0.000000e+00 : f32
    %7 = vector.broadcast %cst : f32 to vector<2x8x128xf32>
    %c0 = arith.constant 0 : index
    %c0_0 = arith.constant 0 : index
    %c0_1 = arith.constant 0 : index
    %8 = vector.load %arg8[%c0, %c0_0, %c0_1] : memref<2x8x512xf32, #tpu.memory_space<vmem>>, vector<2x8x128xf32>
    tpu.vector_store %arg8[%c0, %c0_0, %c0_1], %7 {strides = array<i32>} : memref<2x8x512xf32, #tpu.memory_space<vmem>>, vector<2x8x128xf32>,
    %cst_2 = arith.constant 0.000000e+00 : f32
    %9 = vector.broadcast %cst_2 : f32 to vector<2x8x128xf32>
    %c0_3 = arith.constant 0 : index
    %c0_4 = arith.constant 0 : index
    %c384 = arith.constant 384 : index
    %10 = vector.load %arg8[%c0_3, %c0_4, %c384] : memref<2x8x512xf32, #tpu.memory_space<vmem>>, vector<2x8x128xf32>
    tpu.vector_store %arg8[%c0_3, %c0_4, %c384], %9 {strides = array<i32>} : memref<2x8x512xf32, #tpu.memory_space<vmem>>, vector<2x8x128xf32>,
    %c0_5 = arith.constant 0 : index
    %c0_6 = arith.constant 0 : index
    %c0_7 = arith.constant 0 : index
    %11 = vector.load %arg0[%c0_5, %c0_6, %c0_7] : memref<2x8x256xf32, #tpu.memory_space<vmem>>, vector<2x8x256xf32>
    %c0_8 = arith.constant 0 : index
    %c0_9 = arith.constant 0 : index
    %c128 = arith.constant 128 : index
    %12 = vector.load %arg8[%c0_8, %c0_9, %c128] : memref<2x8x512xf32, #tpu.memory_space<vmem>>, vector<2x8x256xf32>
    tpu.vector_store %arg8[%c0_8, %c0_9, %c128], %11 {strides = array<i32>} : memref<2x8x512xf32, #tpu.memory_space<vmem>>, vector<2x8x256xf32>,
    %c0_10 = arith.constant 0 : index
    %c0_11 = arith.constant 0 : index
    %13 = vector.load %arg1[%c0_10, %c0_11] : memref<8x72xf32, #tpu.memory_space<vmem>>, vector<8x72xf32>
    %c0_12 = arith.constant 0 : index
    %c0_13 = arith.constant 0 : index
    %c0_14 = arith.constant 0 : index
    %14 = vector.load %arg8[%c0_12, %c0_13, %c0_14] : memref<2x8x512xf32, #tpu.memory_space<vmem>>, vector<1x8x512xf32>
    %15 = vector.shape_cast %14 : vector<1x8x512xf32> to vector<8x512xf32>
    %16 = vector.extract_strided_slice %15 {offsets = [0, 77], sizes = [8, 256], strides = [1, 1]} : vector<8x512xf32> to vector<8x256xf32>
    %cst_15 = arith.constant 0.000000e+00 : f32
    %17 = vector.shape_cast %4 : vector<1x256xi1> to vector<1x256xi1>
    %18 = vector.broadcast %17 : vector<1x256xi1> to vector<8x256xi1>
    %19 = vector.broadcast %cst_15 : f32 to vector<8x256xf32>
    %20 = arith.select %18, %16, %19 : vector<8x256xi1>, vector<8x256xf32>
    %21 = vector.extract_strided_slice %15 {offsets = [0, 80], sizes = [8, 256], strides = [1, 1]} : vector<8x512xf32> to vector<8x256xf32>
    %22 = vector.extract_strided_slice %15 {offsets = [0, 83], sizes = [8, 256], strides = [1, 1]} : vector<8x512xf32> to vector<8x256xf32>
    %cst_16 = arith.constant 0.000000e+00 : f32
    %23 = vector.shape_cast %6 : vector<1x256xi1> to vector<1x256xi1>
    %24 = vector.broadcast %23 : vector<1x256xi1> to vector<8x256xi1>
    %25 = vector.broadcast %cst_16 : f32 to vector<8x256xf32>
    %26 = arith.select %24, %22, %25 : vector<8x256xi1>, vector<8x256xf32>
    %27 = vector.extract_strided_slice %15 {offsets = [0, 125], sizes = [8, 256], strides = [1, 1]} : vector<8x512xf32> to vector<8x256xf32>
    %cst_17 = arith.constant 0.000000e+00 : f32
    %28 = vector.shape_cast %4 : vector<1x256xi1> to vector<1x256xi1>
    %29 = vector.broadcast %28 : vector<1x256xi1> to vector<8x256xi1>
    %30 = vector.broadcast %cst_17 : f32 to vector<8x256xf32>
    %31 = arith.select %29, %27, %30 : vector<8x256xi1>, vector<8x256xf32>
    %32 = vector.extract_strided_slice %15 {offsets = [0, 128], sizes = [8, 256], strides = [1, 1]} : vector<8x512xf32> to vector<8x256xf32>
    %33 = vector.extract_strided_slice %15 {offsets = [0, 131], sizes = [8, 256], strides = [1, 1]} : vector<8x512xf32> to vector<8x256xf32>
    %cst_18 = arith.constant 0.000000e+00 : f32
    %34 = vector.shape_cast %6 : vector<1x256xi1> to vector<1x256xi1>
    %35 = vector.broadcast %34 : vector<1x256xi1> to vector<8x256xi1>
    %36 = vector.broadcast %cst_18 : f32 to vector<8x256xf32>
    %37 = arith.select %35, %33, %36 : vector<8x256xi1>, vector<8x256xf32>
    %38 = vector.extract_strided_slice %15 {offsets = [0, 173], sizes = [8, 256], strides = [1, 1]} : vector<8x512xf32> to vector<8x256xf32>
    %cst_19 = arith.constant 0.000000e+00 : f32
    %39 = vector.shape_cast %4 : vector<1x256xi1> to vector<1x256xi1>
    %40 = vector.broadcast %39 : vector<1x256xi1> to vector<8x256xi1>
    %41 = vector.broadcast %cst_19 : f32 to vector<8x256xf32>
    %42 = arith.select %40, %38, %41 : vector<8x256xi1>, vector<8x256xf32>
    %43 = vector.extract_strided_slice %15 {offsets = [0, 176], sizes = [8, 256], strides = [1, 1]} : vector<8x512xf32> to vector<8x256xf32>
    %44 = vector.extract_strided_slice %15 {offsets = [0, 179], sizes = [8, 256], strides = [1, 1]} : vector<8x512xf32> to vector<8x256xf32>
    %cst_20 = arith.constant 0.000000e+00 : f32
    %45 = vector.shape_cast %6 : vector<1x256xi1> to vector<1x256xi1>
    %46 = vector.broadcast %45 : vector<1x256xi1> to vector<8x256xi1>
    %47 = vector.broadcast %cst_20 : f32 to vector<8x256xf32>
    %48 = arith.select %46, %44, %47 : vector<8x256xi1>, vector<8x256xf32>
    %49 = tpu.concatenate %20, %21, %26, %31, %32, %37, %42, %43, %48 in 0 : vector<8x256xf32>, vector<8x256xf32>, vector<8x256xf32>, vector<8x256xf32>, vector<8x256xf32>, vector<8x256xf32>, vector<8x256xf32>, vector<8x256xf32>, vector<8x256xf32> -> vector<72x256xf32>
    %cst_21 = arith.constant dense<0.000000e+00> : vector<8x256xf32>
    %50 = tpu.matmul %13, %49, %cst_21 {dimension_numbers = #tpu.dot_dimension_numbers<[1], [0], [0], [1], [0, 0, 1, 1], [], []>} : vector<8x72xf32>, vector<72x256xf32>, vector<8x256xf32> -> vector<8x256xf32>
    %c1 = arith.constant 1 : index
    %c0_22 = arith.constant 0 : index
    %c0_23 = arith.constant 0 : index
    %51 = vector.load %arg8[%c1, %c0_22, %c0_23] : memref<2x8x512xf32, #tpu.memory_space<vmem>>, vector<1x8x512xf32>
    %52 = vector.shape_cast %51 : vector<1x8x512xf32> to vector<8x512xf32>
    %53 = vector.extract_strided_slice %52 {offsets = [0, 77], sizes = [8, 256], strides = [1, 1]} : vector<8x512xf32> to vector<8x256xf32>
    %cst_24 = arith.constant 0.000000e+00 : f32
    %54 = vector.shape_cast %4 : vector<1x256xi1> to vector<1x256xi1>
    %55 = vector.broadcast %54 : vector<1x256xi1> to vector<8x256xi1>
    %56 = vector.broadcast %cst_24 : f32 to vector<8x256xf32>
    %57 = arith.select %55, %53, %56 : vector<8x256xi1>, vector<8x256xf32>
    %58 = vector.extract_strided_slice %52 {offsets = [0, 80], sizes = [8, 256], strides = [1, 1]} : vector<8x512xf32> to vector<8x256xf32>
    %59 = vector.extract_strided_slice %52 {offsets = [0, 83], sizes = [8, 256], strides = [1, 1]} : vector<8x512xf32> to vector<8x256xf32>
    %cst_25 = arith.constant 0.000000e+00 : f32
    %60 = vector.shape_cast %6 : vector<1x256xi1> to vector<1x256xi1>
    %61 = vector.broadcast %60 : vector<1x256xi1> to vector<8x256xi1>
    %62 = vector.broadcast %cst_25 : f32 to vector<8x256xf32>
    %63 = arith.select %61, %59, %62 : vector<8x256xi1>, vector<8x256xf32>
    %64 = vector.extract_strided_slice %52 {offsets = [0, 125], sizes = [8, 256], strides = [1, 1]} : vector<8x512xf32> to vector<8x256xf32>
    %cst_26 = arith.constant 0.000000e+00 : f32
    %65 = vector.shape_cast %4 : vector<1x256xi1> to vector<1x256xi1>
    %66 = vector.broadcast %65 : vector<1x256xi1> to vector<8x256xi1>
    %67 = vector.broadcast %cst_26 : f32 to vector<8x256xf32>
    %68 = arith.select %66, %64, %67 : vector<8x256xi1>, vector<8x256xf32>
    %69 = vector.extract_strided_slice %52 {offsets = [0, 128], sizes = [8, 256], strides = [1, 1]} : vector<8x512xf32> to vector<8x256xf32>
    %70 = vector.extract_strided_slice %52 {offsets = [0, 131], sizes = [8, 256], strides = [1, 1]} : vector<8x512xf32> to vector<8x256xf32>
    %cst_27 = arith.constant 0.000000e+00 : f32
    %71 = vector.shape_cast %6 : vector<1x256xi1> to vector<1x256xi1>
    %72 = vector.broadcast %71 : vector<1x256xi1> to vector<8x256xi1>
    %73 = vector.broadcast %cst_27 : f32 to vector<8x256xf32>
    %74 = arith.select %72, %70, %73 : vector<8x256xi1>, vector<8x256xf32>
    %75 = vector.extract_strided_slice %52 {offsets = [0, 173], sizes = [8, 256], strides = [1, 1]} : vector<8x512xf32> to vector<8x256xf32>
    %cst_28 = arith.constant 0.000000e+00 : f32
    %76 = vector.shape_cast %4 : vector<1x256xi1> to vector<1x256xi1>
    %77 = vector.broadcast %76 : vector<1x256xi1> to vector<8x256xi1>
    %78 = vector.broadcast %cst_28 : f32 to vector<8x256xf32>
    %79 = arith.select %77, %75, %78 : vector<8x256xi1>, vector<8x256xf32>
    %80 = vector.extract_strided_slice %52 {offsets = [0, 176], sizes = [8, 256], strides = [1, 1]} : vector<8x512xf32> to vector<8x256xf32>
    %81 = vector.extract_strided_slice %52 {offsets = [0, 179], sizes = [8, 256], strides = [1, 1]} : vector<8x512xf32> to vector<8x256xf32>
    %cst_29 = arith.constant 0.000000e+00 : f32
    %82 = vector.shape_cast %6 : vector<1x256xi1> to vector<1x256xi1>
    %83 = vector.broadcast %82 : vector<1x256xi1> to vector<8x256xi1>
    %84 = vector.broadcast %cst_29 : f32 to vector<8x256xf32>
    %85 = arith.select %83, %81, %84 : vector<8x256xi1>, vector<8x256xf32>
    %86 = tpu.concatenate %57, %58, %63, %68, %69, %74, %79, %80, %85 in 0 : vector<8x256xf32>, vector<8x256xf32>, vector<8x256xf32>, vector<8x256xf32>, vector<8x256xf32>, vector<8x256xf32>, vector<8x256xf32>, vector<8x256xf32>, vector<8x256xf32> -> vector<72x256xf32>
    %cst_30 = arith.constant dense<0.000000e+00> : vector<8x256xf32>
    %87 = tpu.matmul %13, %86, %cst_30 {dimension_numbers = #tpu.dot_dimension_numbers<[1], [0], [0], [1], [0, 0, 1, 1], [], []>} : vector<8x72xf32>, vector<72x256xf32>, vector<8x256xf32> -> vector<8x256xf32>
    %cst_31 = arith.constant dense<0.000000e+00> : vector<8xf32>
    %88 = vector.multi_reduction <add>, %50, %cst_31 [1] : vector<8x256xf32> to vector<8xf32>
    %89 = vector.shape_cast %88 : vector<8xf32> to vector<8x1xf32>
    %cst_32 = arith.constant dense<0.000000e+00> : vector<8xf32>
    %90 = vector.multi_reduction <add>, %87, %cst_32 [1] : vector<8x256xf32> to vector<8xf32>
    %91 = vector.shape_cast %90 : vector<8xf32> to vector<8x1xf32>
    %92 = arith.addf %89, %91 : vector<8x1xf32>
    %cst_33 = arith.constant 0.001953125 : f32
    %93 = vector.broadcast %cst_33 : f32 to vector<8x1xf32>
    %94 = arith.mulf %92, %93 : vector<8x1xf32>
    %95 = vector.broadcast %94 : vector<8x1xf32> to vector<8x256xf32>
    %96 = arith.subf %50, %95 : vector<8x256xf32>
    %97 = vector.broadcast %94 : vector<8x1xf32> to vector<8x256xf32>
    %98 = arith.subf %87, %97 : vector<8x256xf32>
    %99 = arith.mulf %96, %96 : vector<8x256xf32>
    %cst_34 = arith.constant dense<0.000000e+00> : vector<8xf32>
    %100 = vector.multi_reduction <add>, %99, %cst_34 [1] : vector<8x256xf32> to vector<8xf32>
    %101 = vector.shape_cast %100 : vector<8xf32> to vector<8x1xf32>
    %102 = arith.mulf %98, %98 : vector<8x256xf32>
    %cst_35 = arith.constant dense<0.000000e+00> : vector<8xf32>
    %103 = vector.multi_reduction <add>, %102, %cst_35 [1] : vector<8x256xf32> to vector<8xf32>
    %104 = vector.shape_cast %103 : vector<8xf32> to vector<8x1xf32>
    %105 = arith.addf %101, %104 : vector<8x1xf32>
    %cst_36 = arith.constant 0.001953125 : f32
    %106 = vector.broadcast %cst_36 : f32 to vector<8x1xf32>
    %107 = arith.mulf %105, %106 : vector<8x1xf32>
    %c0_37 = arith.constant 0 : index
    %c0_38 = arith.constant 0 : index
    %108 = vector.load %arg3[%c0_37, %c0_38] : memref<8x1xf32, #tpu.memory_space<vmem>>, vector<8x1xf32>
    %cst_39 = arith.constant 9.99999974E-6 : f32
    %109 = vector.broadcast %cst_39 : f32 to vector<8x1xf32>
    %110 = arith.addf %107, %109 : vector<8x1xf32>
    %111 = math.rsqrt %110 : vector<8x1xf32>
    %112 = arith.mulf %108, %111 : vector<8x1xf32>
    %c0_40 = arith.constant 0 : index
    %c0_41 = arith.constant 0 : index
    %113 = vector.load %arg4[%c0_40, %c0_41] : memref<8x1xf32, #tpu.memory_space<vmem>>, vector<8x1xf32>
    %114 = vector.broadcast %112 : vector<8x1xf32> to vector<8x256xf32>
    %115 = arith.mulf %96, %114 : vector<8x256xf32>
    %116 = vector.broadcast %113 : vector<8x1xf32> to vector<8x256xf32>
    %117 = arith.addf %115, %116 : vector<8x256xf32>
    %118 = vector.broadcast %112 : vector<8x1xf32> to vector<8x256xf32>
    %119 = arith.mulf %98, %118 : vector<8x256xf32>
    %120 = vector.broadcast %113 : vector<8x1xf32> to vector<8x256xf32>
    %121 = arith.addf %119, %120 : vector<8x256xf32>
    %cst_42 = arith.constant 0.000000e+00 : f32
    %122 = vector.broadcast %cst_42 : f32 to vector<8x256xf32>
    %123 = arith.maximumf %117, %122 : vector<8x256xf32>
    %c0_43 = arith.constant 0 : index
    %c0_44 = arith.constant 0 : index
    %c128_45 = arith.constant 128 : index
    %124 = vector.load %arg8[%c0_43, %c0_44, %c128_45] : memref<2x8x512xf32, #tpu.memory_space<vmem>>, vector<1x8x256xf32>
    %125 = vector.shape_cast %124 : vector<1x8x256xf32> to vector<8x256xf32>
    %126 = vector.shape_cast %123 : vector<8x256xf32> to vector<1x8x256xf32>
    tpu.vector_store %arg8[%c0_43, %c0_44, %c128_45], %126 {strides = array<i32>} : memref<2x8x512xf32, #tpu.memory_space<vmem>>, vector<1x8x256xf32>,
    %cst_46 = arith.constant 0.000000e+00 : f32
    %127 = vector.broadcast %cst_46 : f32 to vector<8x256xf32>
    %128 = arith.maximumf %121, %127 : vector<8x256xf32>
    %c1_47 = arith.constant 1 : index
    %c0_48 = arith.constant 0 : index
    %c128_49 = arith.constant 128 : index
    %129 = vector.load %arg8[%c1_47, %c0_48, %c128_49] : memref<2x8x512xf32, #tpu.memory_space<vmem>>, vector<1x8x256xf32>
    %130 = vector.shape_cast %129 : vector<1x8x256xf32> to vector<8x256xf32>
    %131 = vector.shape_cast %128 : vector<8x256xf32> to vector<1x8x256xf32>
    tpu.vector_store %arg8[%c1_47, %c0_48, %c128_49], %131 {strides = array<i32>} : memref<2x8x512xf32, #tpu.memory_space<vmem>>, vector<1x8x256xf32>,
    %c0_50 = arith.constant 0 : index
    %c0_51 = arith.constant 0 : index
    %132 = vector.load %arg2[%c0_50, %c0_51] : memref<8x72xf32, #tpu.memory_space<vmem>>, vector<8x72xf32>
    %c0_52 = arith.constant 0 : index
    %c0_53 = arith.constant 0 : index
    %c0_54 = arith.constant 0 : index
    %133 = vector.load %arg8[%c0_52, %c0_53, %c0_54] : memref<2x8x512xf32, #tpu.memory_space<vmem>>, vector<1x8x512xf32>
    %134 = vector.shape_cast %133 : vector<1x8x512xf32> to vector<8x512xf32>
    %135 = vector.extract_strided_slice %134 {offsets = [0, 77], sizes = [8, 256], strides = [1, 1]} : vector<8x512xf32> to vector<8x256xf32>
    %cst_55 = arith.constant 0.000000e+00 : f32
    %136 = vector.shape_cast %4 : vector<1x256xi1> to vector<1x256xi1>
    %137 = vector.broadcast %136 : vector<1x256xi1> to vector<8x256xi1>
    %138 = vector.broadcast %cst_55 : f32 to vector<8x256xf32>
    %139 = arith.select %137, %135, %138 : vector<8x256xi1>, vector<8x256xf32>
    %140 = vector.extract_strided_slice %134 {offsets = [0, 80], sizes = [8, 256], strides = [1, 1]} : vector<8x512xf32> to vector<8x256xf32>
    %141 = vector.extract_strided_slice %134 {offsets = [0, 83], sizes = [8, 256], strides = [1, 1]} : vector<8x512xf32> to vector<8x256xf32>
    %cst_56 = arith.constant 0.000000e+00 : f32
    %142 = vector.shape_cast %6 : vector<1x256xi1> to vector<1x256xi1>
    %143 = vector.broadcast %142 : vector<1x256xi1> to vector<8x256xi1>
    %144 = vector.broadcast %cst_56 : f32 to vector<8x256xf32>
    %145 = arith.select %143, %141, %144 : vector<8x256xi1>, vector<8x256xf32>
    %146 = vector.extract_strided_slice %134 {offsets = [0, 125], sizes = [8, 256], strides = [1, 1]} : vector<8x512xf32> to vector<8x256xf32>
    %cst_57 = arith.constant 0.000000e+00 : f32
    %147 = vector.shape_cast %4 : vector<1x256xi1> to vector<1x256xi1>
    %148 = vector.broadcast %147 : vector<1x256xi1> to vector<8x256xi1>
    %149 = vector.broadcast %cst_57 : f32 to vector<8x256xf32>
    %150 = arith.select %148, %146, %149 : vector<8x256xi1>, vector<8x256xf32>
    %151 = vector.extract_strided_slice %134 {offsets = [0, 128], sizes = [8, 256], strides = [1, 1]} : vector<8x512xf32> to vector<8x256xf32>
    %152 = vector.extract_strided_slice %134 {offsets = [0, 131], sizes = [8, 256], strides = [1, 1]} : vector<8x512xf32> to vector<8x256xf32>
    %cst_58 = arith.constant 0.000000e+00 : f32
    %153 = vector.shape_cast %6 : vector<1x256xi1> to vector<1x256xi1>
    %154 = vector.broadcast %153 : vector<1x256xi1> to vector<8x256xi1>
    %155 = vector.broadcast %cst_58 : f32 to vector<8x256xf32>
    %156 = arith.select %154, %152, %155 : vector<8x256xi1>, vector<8x256xf32>
    %157 = vector.extract_strided_slice %134 {offsets = [0, 173], sizes = [8, 256], strides = [1, 1]} : vector<8x512xf32> to vector<8x256xf32>
    %cst_59 = arith.constant 0.000000e+00 : f32
    %158 = vector.shape_cast %4 : vector<1x256xi1> to vector<1x256xi1>
    %159 = vector.broadcast %158 : vector<1x256xi1> to vector<8x256xi1>
    %160 = vector.broadcast %cst_59 : f32 to vector<8x256xf32>
    %161 = arith.select %159, %157, %160 : vector<8x256xi1>, vector<8x256xf32>
    %162 = vector.extract_strided_slice %134 {offsets = [0, 176], sizes = [8, 256], strides = [1, 1]} : vector<8x512xf32> to vector<8x256xf32>
    %163 = vector.extract_strided_slice %134 {offsets = [0, 179], sizes = [8, 256], strides = [1, 1]} : vector<8x512xf32> to vector<8x256xf32>
    %cst_60 = arith.constant 0.000000e+00 : f32
    %164 = vector.shape_cast %6 : vector<1x256xi1> to vector<1x256xi1>
    %165 = vector.broadcast %164 : vector<1x256xi1> to vector<8x256xi1>
    %166 = vector.broadcast %cst_60 : f32 to vector<8x256xf32>
    %167 = arith.select %165, %163, %166 : vector<8x256xi1>, vector<8x256xf32>
    %168 = tpu.concatenate %139, %140, %145, %150, %151, %156, %161, %162, %167 in 0 : vector<8x256xf32>, vector<8x256xf32>, vector<8x256xf32>, vector<8x256xf32>, vector<8x256xf32>, vector<8x256xf32>, vector<8x256xf32>, vector<8x256xf32>, vector<8x256xf32> -> vector<72x256xf32>
    %cst_61 = arith.constant dense<0.000000e+00> : vector<8x256xf32>
    %169 = tpu.matmul %132, %168, %cst_61 {dimension_numbers = #tpu.dot_dimension_numbers<[1], [0], [0], [1], [0, 0, 1, 1], [], []>} : vector<8x72xf32>, vector<72x256xf32>, vector<8x256xf32> -> vector<8x256xf32>
    %c1_62 = arith.constant 1 : index
    %c0_63 = arith.constant 0 : index
    %c0_64 = arith.constant 0 : index
    %170 = vector.load %arg8[%c1_62, %c0_63, %c0_64] : memref<2x8x512xf32, #tpu.memory_space<vmem>>, vector<1x8x512xf32>
    %171 = vector.shape_cast %170 : vector<1x8x512xf32> to vector<8x512xf32>
    %172 = vector.extract_strided_slice %171 {offsets = [0, 77], sizes = [8, 256], strides = [1, 1]} : vector<8x512xf32> to vector<8x256xf32>
    %cst_65 = arith.constant 0.000000e+00 : f32
    %173 = vector.shape_cast %4 : vector<1x256xi1> to vector<1x256xi1>
    %174 = vector.broadcast %173 : vector<1x256xi1> to vector<8x256xi1>
    %175 = vector.broadcast %cst_65 : f32 to vector<8x256xf32>
    %176 = arith.select %174, %172, %175 : vector<8x256xi1>, vector<8x256xf32>
    %177 = vector.extract_strided_slice %171 {offsets = [0, 80], sizes = [8, 256], strides = [1, 1]} : vector<8x512xf32> to vector<8x256xf32>
    %178 = vector.extract_strided_slice %171 {offsets = [0, 83], sizes = [8, 256], strides = [1, 1]} : vector<8x512xf32> to vector<8x256xf32>
    %cst_66 = arith.constant 0.000000e+00 : f32
    %179 = vector.shape_cast %6 : vector<1x256xi1> to vector<1x256xi1>
    %180 = vector.broadcast %179 : vector<1x256xi1> to vector<8x256xi1>
    %181 = vector.broadcast %cst_66 : f32 to vector<8x256xf32>
    %182 = arith.select %180, %178, %181 : vector<8x256xi1>, vector<8x256xf32>
    %183 = vector.extract_strided_slice %171 {offsets = [0, 125], sizes = [8, 256], strides = [1, 1]} : vector<8x512xf32> to vector<8x256xf32>
    %cst_67 = arith.constant 0.000000e+00 : f32
    %184 = vector.shape_cast %4 : vector<1x256xi1> to vector<1x256xi1>
    %185 = vector.broadcast %184 : vector<1x256xi1> to vector<8x256xi1>
    %186 = vector.broadcast %cst_67 : f32 to vector<8x256xf32>
    %187 = arith.select %185, %183, %186 : vector<8x256xi1>, vector<8x256xf32>
    %188 = vector.extract_strided_slice %171 {offsets = [0, 128], sizes = [8, 256], strides = [1, 1]} : vector<8x512xf32> to vector<8x256xf32>
    %189 = vector.extract_strided_slice %171 {offsets = [0, 131], sizes = [8, 256], strides = [1, 1]} : vector<8x512xf32> to vector<8x256xf32>
    %cst_68 = arith.constant 0.000000e+00 : f32
    %190 = vector.shape_cast %6 : vector<1x256xi1> to vector<1x256xi1>
    %191 = vector.broadcast %190 : vector<1x256xi1> to vector<8x256xi1>
    %192 = vector.broadcast %cst_68 : f32 to vector<8x256xf32>
    %193 = arith.select %191, %189, %192 : vector<8x256xi1>, vector<8x256xf32>
    %194 = vector.extract_strided_slice %171 {offsets = [0, 173], sizes = [8, 256], strides = [1, 1]} : vector<8x512xf32> to vector<8x256xf32>
    %cst_69 = arith.constant 0.000000e+00 : f32
    %195 = vector.shape_cast %4 : vector<1x256xi1> to vector<1x256xi1>
    %196 = vector.broadcast %195 : vector<1x256xi1> to vector<8x256xi1>
    %197 = vector.broadcast %cst_69 : f32 to vector<8x256xf32>
    %198 = arith.select %196, %194, %197 : vector<8x256xi1>, vector<8x256xf32>
    %199 = vector.extract_strided_slice %171 {offsets = [0, 176], sizes = [8, 256], strides = [1, 1]} : vector<8x512xf32> to vector<8x256xf32>
    %200 = vector.extract_strided_slice %171 {offsets = [0, 179], sizes = [8, 256], strides = [1, 1]} : vector<8x512xf32> to vector<8x256xf32>
    %cst_70 = arith.constant 0.000000e+00 : f32
    %201 = vector.shape_cast %6 : vector<1x256xi1> to vector<1x256xi1>
    %202 = vector.broadcast %201 : vector<1x256xi1> to vector<8x256xi1>
    %203 = vector.broadcast %cst_70 : f32 to vector<8x256xf32>
    %204 = arith.select %202, %200, %203 : vector<8x256xi1>, vector<8x256xf32>
    %205 = tpu.concatenate %176, %177, %182, %187, %188, %193, %198, %199, %204 in 0 : vector<8x256xf32>, vector<8x256xf32>, vector<8x256xf32>, vector<8x256xf32>, vector<8x256xf32>, vector<8x256xf32>, vector<8x256xf32>, vector<8x256xf32>, vector<8x256xf32> -> vector<72x256xf32>
    %cst_71 = arith.constant dense<0.000000e+00> : vector<8x256xf32>
    %206 = tpu.matmul %132, %205, %cst_71 {dimension_numbers = #tpu.dot_dimension_numbers<[1], [0], [0], [1], [0, 0, 1, 1], [], []>} : vector<8x72xf32>, vector<72x256xf32>, vector<8x256xf32> -> vector<8x256xf32>
    %cst_72 = arith.constant dense<0.000000e+00> : vector<8xf32>
    %207 = vector.multi_reduction <add>, %169, %cst_72 [1] : vector<8x256xf32> to vector<8xf32>
    %208 = vector.shape_cast %207 : vector<8xf32> to vector<8x1xf32>
    %cst_73 = arith.constant dense<0.000000e+00> : vector<8xf32>
    %209 = vector.multi_reduction <add>, %206, %cst_73 [1] : vector<8x256xf32> to vector<8xf32>
    %210 = vector.shape_cast %209 : vector<8xf32> to vector<8x1xf32>
    %211 = arith.addf %208, %210 : vector<8x1xf32>
    %cst_74 = arith.constant 0.001953125 : f32
    %212 = vector.broadcast %cst_74 : f32 to vector<8x1xf32>
    %213 = arith.mulf %211, %212 : vector<8x1xf32>
    %214 = vector.broadcast %213 : vector<8x1xf32> to vector<8x256xf32>
    %215 = arith.subf %169, %214 : vector<8x256xf32>
    %216 = vector.broadcast %213 : vector<8x1xf32> to vector<8x256xf32>
    %217 = arith.subf %206, %216 : vector<8x256xf32>
    %218 = arith.mulf %215, %215 : vector<8x256xf32>
    %cst_75 = arith.constant dense<0.000000e+00> : vector<8xf32>
    %219 = vector.multi_reduction <add>, %218, %cst_75 [1] : vector<8x256xf32> to vector<8xf32>
    %220 = vector.shape_cast %219 : vector<8xf32> to vector<8x1xf32>
    %221 = arith.mulf %217, %217 : vector<8x256xf32>
    %cst_76 = arith.constant dense<0.000000e+00> : vector<8xf32>
    %222 = vector.multi_reduction <add>, %221, %cst_76 [1] : vector<8x256xf32> to vector<8xf32>
    %223 = vector.shape_cast %222 : vector<8xf32> to vector<8x1xf32>
    %224 = arith.addf %220, %223 : vector<8x1xf32>
    %cst_77 = arith.constant 0.001953125 : f32
    %225 = vector.broadcast %cst_77 : f32 to vector<8x1xf32>
    %226 = arith.mulf %224, %225 : vector<8x1xf32>
    %c0_78 = arith.constant 0 : index
    %c0_79 = arith.constant 0 : index
    %227 = vector.load %arg5[%c0_78, %c0_79] : memref<8x1xf32, #tpu.memory_space<vmem>>, vector<8x1xf32>
    %cst_80 = arith.constant 9.99999974E-6 : f32
    %228 = vector.broadcast %cst_80 : f32 to vector<8x1xf32>
    %229 = arith.addf %226, %228 : vector<8x1xf32>
    %230 = math.rsqrt %229 : vector<8x1xf32>
    %231 = arith.mulf %227, %230 : vector<8x1xf32>
    %c0_81 = arith.constant 0 : index
    %c0_82 = arith.constant 0 : index
    %232 = vector.load %arg6[%c0_81, %c0_82] : memref<8x1xf32, #tpu.memory_space<vmem>>, vector<8x1xf32>
    %233 = vector.broadcast %231 : vector<8x1xf32> to vector<8x256xf32>
    %234 = arith.mulf %215, %233 : vector<8x256xf32>
    %235 = vector.broadcast %232 : vector<8x1xf32> to vector<8x256xf32>
    %236 = arith.addf %234, %235 : vector<8x256xf32>
    %237 = vector.broadcast %231 : vector<8x1xf32> to vector<8x256xf32>
    %238 = arith.mulf %217, %237 : vector<8x256xf32>
    %239 = vector.broadcast %232 : vector<8x1xf32> to vector<8x256xf32>
    %240 = arith.addf %238, %239 : vector<8x256xf32>
    %c0_83 = arith.constant 0 : index
    %c0_84 = arith.constant 0 : index
    %c0_85 = arith.constant 0 : index
    %241 = vector.load %arg0[%c0_83, %c0_84, %c0_85] : memref<2x8x256xf32, #tpu.memory_space<vmem>>, vector<1x8x256xf32>
    %242 = vector.shape_cast %241 : vector<1x8x256xf32> to vector<8x256xf32>
    %243 = arith.addf %236, %242 : vector<8x256xf32>
    %cst_86 = arith.constant 0.000000e+00 : f32
    %244 = vector.broadcast %cst_86 : f32 to vector<8x256xf32>
    %245 = arith.maximumf %243, %244 : vector<8x256xf32>
    %c0_87 = arith.constant 0 : index
    %c0_88 = arith.constant 0 : index
    %c0_89 = arith.constant 0 : index
    %246 = vector.load %arg7[%c0_87, %c0_88, %c0_89] : memref<2x8x256xf32, #tpu.memory_space<vmem>>, vector<1x8x256xf32>
    %247 = vector.shape_cast %246 : vector<1x8x256xf32> to vector<8x256xf32>
    %248 = vector.shape_cast %245 : vector<8x256xf32> to vector<1x8x256xf32>
    tpu.vector_store %arg7[%c0_87, %c0_88, %c0_89], %248 {strides = array<i32>} : memref<2x8x256xf32, #tpu.memory_space<vmem>>, vector<1x8x256xf32>,
    %c1_90 = arith.constant 1 : index
    %c0_91 = arith.constant 0 : index
    %c0_92 = arith.constant 0 : index
    %249 = vector.load %arg0[%c1_90, %c0_91, %c0_92] : memref<2x8x256xf32, #tpu.memory_space<vmem>>, vector<1x8x256xf32>
    %250 = vector.shape_cast %249 : vector<1x8x256xf32> to vector<8x256xf32>
    %251 = arith.addf %240, %250 : vector<8x256xf32>
    %cst_93 = arith.constant 0.000000e+00 : f32
    %252 = vector.broadcast %cst_93 : f32 to vector<8x256xf32>
    %253 = arith.maximumf %251, %252 : vector<8x256xf32>
    %c1_94 = arith.constant 1 : index
    %c0_95 = arith.constant 0 : index
    %c0_96 = arith.constant 0 : index
    %254 = vector.load %arg7[%c1_94, %c0_95, %c0_96] : memref<2x8x256xf32, #tpu.memory_space<vmem>>, vector<1x8x256xf32>
    %255 = vector.shape_cast %254 : vector<1x8x256xf32> to vector<8x256xf32>
    %256 = vector.shape_cast %253 : vector<8x256xf32> to vector<1x8x256xf32>
    tpu.vector_store %arg7[%c1_94, %c0_95, %c0_96], %256 {strides = array<i32>} : memref<2x8x256xf32, #tpu.memory_space<vmem>>, vector<1x8x256xf32>,
    return
  }
}

</mosaic_0001>

<bundles_post_ra>
// kernel: tpu_custom_call.1
= control target key start
LH: loop header
LB: loop body
LE: loop exit
PB: predicated region body
PF: predicated region fallthrough
CT: control target
= control target key end

     0   :  { %12 = vsyncpa [#allocation4], 0  ;;  %s1806_s0 = inlined_call_operand.vmem [shape: f32[2,8,256], index: 0, kind: input, shape index: {}]   ;;  %s1807_s1 = inlined_call_operand.hbm [shape: f32[8,72], index: 1, kind: input, shape index: {}]   ;;  %s1808_s2 = inlined_call_operand.vmem [shape: f32[8,72], index: 2, kind: input, shape index: {}]   ;;  %s1809_s3 = inlined_call_operand.vmem [shape: f32[8,1], index: 3, kind: input, shape index: {}]   ;;  %s1810_s4 = inlined_call_operand.vmem [shape: f32[8,1], index: 4, kind: input, shape index: {}]   ;;  %s1811_s5 = inlined_call_operand.vmem [shape: f32[8,1], index: 5, kind: input, shape index: {}]   ;;  %s1812_s6 = inlined_call_operand.vmem [shape: f32[8,1], index: 6, kind: input, shape index: {}]   ;;  %s1813_s7 = inlined_call_operand.hbm [shape: f32[2,8,256], index: 7, kind: output, shape index: {}]  }
   0x1   :  { %13 = vsyncpa [#allocation5], 0  ;;  %s1346_s24 = smov [#allocation3]   ;;  %s1298_s28 = scalar_lea.hbm %s1807_s1, 128 }
   0x2   :  { %s22_s25 = sshll.u32 %s1346_s24, 4  ;;  %p1299_p0 = scmp.ne.s32.totalorder %s1807_s1, %s1298_s28  ;;  %s23_s25 = int_to_ptr.vmem [resolvable:$true] %s22_s25 }
   0x3   :  { %p1302_p1 = scmp.lt.u32.totalorder %s1298_s28, %s1807_s1 }
   0x5   :  { %p1304_p2 = pnand %p1302_p1, %p1299_p0 }
   0x7   :  { %1307 = shalt.err (!%p1304_p2)
}
   0x8   :  { %s1308_s10 = scalar_lea.vmem %s23_s25, 128  ;;  %p1313_p4 = scmp.lt.s32.totalorder %s23_s25, %s23_s25 }
   0x9   :  { %p1309_p3 = scmp.ne.s32.totalorder %s23_s25, %s1308_s10  ;;  %p1314_p5 = scmp.lt.s32.totalorder %s1308_s10, %s1308_s10 }
   0xb   :  { %p1315_p6 = por %p1314_p5, %p1313_p4 }
   0xd   :  { %p1316_p7 = pnand %p1315_p6, %p1309_p3 }
   0xf   :  { %1319 = shalt.err (!%p1316_p7)
}
  0x10   :  { %25 = dma.hbm_to_vmem [thread:$0]  %s1807_s1, 128, %s23_s25, [#allocation4]  }
  0x11   :  { %1342 = dma.done.wait [#allocation4], 128  }
  0x12   :  { %1343 = vsyncadd [#allocation4], 4294967168  ;;  %v1347_v0 = vmov 0.0   ;;  %s1348_s13 = smov 48   ;;  %s1349_s14 = smov 51   ;;  %v1422_v1 = vld [vmem:[%s1806_s0 + $0x10] sm:$0xff]  ;;  %v39_v10 = vlaneseq }
  0x13   :  { %245 = vmatprep.mubr.f32.mxu0 %v1347_v0  ;;  %417 = vmatprep.mubr.f32.mxu1 %v1347_v0  ;;  %v1427_v2 = vld [vmem:[%s1806_s0 + $0x18] sm:$0xff]  ;;  %v1432_v3 = vld [vmem:[%s1806_s0] sm:$0xff]  ;;  %v1439_v5 = vld [vmem:[%s1806_s0 + $0x8] sm:$0xff]  ;;  %s1350_s22 = smov 3   ;;  %s1351_s23 = smov 45   ;;  %vm108_vm0 = vcmask 23552  }
  0x14   :  { %1078 = vrot.lane.b32.xlu1 %v1347_v0, %s1348_s13  ;;  %1073 = vrot.lane.b32.xlu0 %v1347_v0, %s1349_s14  ;;  %v1092_v4 = vpack.i.bf16 %v1427_v2, %v1422_v1  ;;  %v1082_v6 = vpack.i.bf16 %v1439_v5, %v1432_v3  ;;  %v1137_v7 = vpack.i.bf16 %v1347_v0, %v1427_v2  ;;  %s1352_s0 = smov 125   ;;  %s1353_s24 = smov 83   ;;  %v1480_v11 = vand.u32 127, %v39_v10 }
  0x15   :  { %v1132_v8 = vpack.i.bf16 %v1347_v0, %v1439_v5  ;;  %v1142_v9 = vpack.i.bf16 %v1422_v1, %v1432_v3  ;;  %s1354_s25 = smov 80   ;;  %s1355_s26 = smov 77   ;;  %vm78_vm1 = vcmask 416768   ;;  %vm161_vm2 = vcmask 392192  }
  0x16   :  { %v41_v14 = vadd.s32 128, %v1480_v11  ;;  %v42_v15 = vand.u32 15, %v1480_v11  ;;  %vm95_vm3 = vcmask 367616   ;;  %vm1356_vm7 = vmmov 1  }
  0x17   :  { %vm122_vm12 = vcmask 1022976  }
  0x18   :  { %1093 = vrot.lane.b32.xlu1 %v1092_v4, %s1349_s14  ;;  %1083 = vrot.lane.b32.xlu0 %v1082_v6, %s1349_s14  ;;  %v43_v17 = vand.u32 15, %v41_v14  ;;  %vm1486_vm4 = vcmp.ge.s32.totalorder %v42_v15, 3  ;;  %vm1544_vm11 = vcmp.lt.s32.totalorder %v42_v15, 13 }
  0x19   :  { %vm1516_vm9 = vmpackc.low %vm1356_vm7, %vm1486_vm4 }
  0x1a   :  { %vm1490_vm5 = vcmp.ge.s32.totalorder %v43_v17, 3  ;;  %vm1494_vm6 = vcmp.lt.s32.totalorder %v43_v17, 13  ;;  %vm1558_vm13 = vmpackc.low %vm1486_vm4, %vm1544_vm11  ;;  %vm1814_vm4 = vcmask 678912  }
  0x1b   :  { %vm1504_vm8 = vmpackc.low %vm1356_vm7, %vm1490_vm5 }
  0x1c   :  { %1098 = vrot.lane.b32.xlu1 %v1092_v4, %s1348_s13  ;;  %1088 = vrot.lane.b32.xlu0 %v1082_v6, %s1348_s13  ;;  %vm1534_vm10 = vmpackc.low %vm1490_vm5, %vm1494_vm6  ;;  %vm172_vm5 = vcmask 654336  }
  0x1d   :  { %vm1570_vm14 = vmpackc.low %vm1494_vm6, %vm1356_vm7 }
  0x1e   :  { %vm1586_vm15 = vmpackc.low %vm1544_vm11, %vm1356_vm7  ;;  %vm148_vm7 = vcmask 629760  }
  0x20   :  { %1108 = vrot.lane.b32.xlu1 %v1082_v6, %s1350_s22  ;;  %1103 = vrot.lane.b32.xlu0 %v1082_v6, %s1351_s23 }
  0x24   :  { %1118 = vrot.lane.b32.xlu1 %v1092_v4, %s1350_s22  ;;  %1113 = vrot.lane.b32.xlu0 %v1092_v4, %s1351_s23 }
  0x28   :  { %1128 = vrot.lane.b32.xlu1 %v1347_v0, %s1350_s22  ;;  %1123 = vrot.lane.b32.xlu0 %v1347_v0, %s1351_s23 }
  0x2c   :  { %1138 = vrot.lane.b32.xlu1 %v1137_v7, %s1352_s0  ;;  %1133 = vrot.lane.b32.xlu0 %v1132_v8, %s1352_s0 }
  0x30   :  { %1148 = vrot.lane.b32.xlu1 %v1132_v8, %s1353_s24  ;;  %1143 = vrot.lane.b32.xlu0 %v1142_v9, %s1352_s0 }
  0x34   :  { %1158 = vrot.lane.b32.xlu1 %v1137_v7, %s1353_s24  ;;  %1153 = vrot.lane.b32.xlu0 %v1132_v8, %s1354_s25 }
  0x38   :  { %1168 = vrot.lane.b32.xlu1 %v1142_v9, %s1353_s24  ;;  %1163 = vrot.lane.b32.xlu0 %v1137_v7, %s1354_s25 }
  0x3c   :  { %144 = vrot.lane.b32.xlu1 %v1439_v5, %s1355_s26  ;;  %1173 = vrot.lane.b32.xlu0 %v1142_v9, %s1354_s25 }
  0x40   :  { %323 = vrot.lane.b32.xlu1 %v1427_v2, %s1355_s26  ;;  %1178 = vrot.lane.b32.xlu0 %v1347_v0, %s1355_s26 }
  0x44   :  { %321 = vrot.lane.b32.xlu1 %v1422_v1, %s1355_s26  ;;  %142 = vrot.lane.b32.xlu0 %v1432_v3, %s1355_s26 }
  0x86   :  { %v1079_v12 = vpop.permute.xlu1 %1078  ;;  %v1074_v13 = vpop.permute.xlu0 %1073 }
  0x87   :  { %v1081_v24 = vunpack.i.h.bf16 %v1079_v12  ;;  %v1076_v25 = vunpack.i.h.bf16 %v1074_v13  ;;  %v1080_v29 = vunpack.i.l.bf16 %v1079_v12  ;;  %v1075_v30 = vunpack.i.l.bf16 %v1074_v13 }
  0x8a   :  { %v1094_v16 = vpop.permute.xlu1 %1093  ;;  %v1084_v18 = vpop.permute.xlu0 %1083 }
  0x8b   :  { %v1096_v19 = vunpack.i.h.bf16 %v1094_v16  ;;  %v1095_v20 = vunpack.i.l.bf16 %v1094_v16  ;;  %v1086_v21 = vunpack.i.h.bf16 %v1084_v18  ;;  %v1085_v22 = vunpack.i.l.bf16 %v1084_v18 }
  0x8d   :  { %v267_v36 = vsel %vm78_vm1, %v1095_v20, %v1096_v19  ;;  %v266_v37 = vsel %vm78_vm1, %v1076_v25, %v1095_v20  ;;  %v80_v38 = vsel %vm78_vm1, %v1085_v22, %v1086_v21  ;;  %v79_v41 = vsel %vm78_vm1, %v1075_v30, %v1085_v22 }
  0x8e   :  { %v1099_v26 = vpop.permute.xlu1 %1098  ;;  %v1089_v33 = vpop.permute.xlu0 %1088 }
  0x8f   :  { %v1101_v31 = vunpack.i.h.bf16 %v1099_v26  ;;  %v1100_v32 = vunpack.i.l.bf16 %v1099_v26  ;;  %v1091_v34 = vunpack.i.h.bf16 %v1089_v33  ;;  %v1090_v35 = vunpack.i.l.bf16 %v1089_v33 }
  0x91   :  { %v340_v40 = vsel %vm161_vm2, %v1100_v32, %v1101_v31  ;;  %v339_v42 = vsel %vm161_vm2, %v1081_v24, %v1100_v32  ;;  %v163_v44 = vsel %vm161_vm2, %v1090_v35, %v1091_v34  ;;  %v162_v46 = vsel %vm161_vm2, %v1080_v29, %v1090_v35 }
  0x92   :  { %v1109_v43 = vpop.permute.xlu1 %1108  ;;  %v985_v45 = vpack.c.bf16 %v340_v40, %v267_v36  ;;  %v988_v48 = vpack.c.bf16 %v339_v42, %v266_v37  ;;  %v1104_v51 = vpop.permute.xlu0 %1103  ;;  %v961_v52 = vpack.c.bf16 %v163_v44, %v80_v38  ;;  %v964_v53 = vpack.c.bf16 %v162_v46, %v79_v41 }
  0x93   :  { %v1111_v49 = vunpack.i.h.bf16 %v1109_v43  ;;  %v1110_v50 = vunpack.i.l.bf16 %v1109_v43  ;;  %v1106_v54 = vunpack.i.h.bf16 %v1104_v51  ;;  %v1105_v55 = vunpack.i.l.bf16 %v1104_v51 }
  0x94   :  { %987 = vmatprep.subr.msk.bf16.mxu1 %vm1504_vm8, %v985_v45  ;;  %963 = vmatprep.subr.msk.bf16.mxu0 %vm1504_vm8, %v961_v52 }
  0x95   :  { %v110_v56 = vsel %vm108_vm0, %v1110_v50, %v1111_v49  ;;  %990 = vmatpush1.bf16.msk.msra.mxu1 %vm1516_vm9, %v988_v48  ;;  %v97_v57 = vsel %vm95_vm3, %v1105_v55, %v1106_v54  ;;  %966 = vmatpush1.bf16.msk.msra.mxu0 %vm1516_vm9, %v964_v53 }
  0x96   :  { %v1119_v58 = vpop.permute.xlu1 %1118  ;;  %v967_v60 = vpack.c.bf16 %v110_v56, %v97_v57  ;;  %v1114_v63 = vpop.permute.xlu0 %1113 }
  0x97   :  { %v1121_v61 = vunpack.i.h.bf16 %v1119_v58  ;;  %v1120_v62 = vunpack.i.l.bf16 %v1119_v58  ;;  %v1116_v4 = vunpack.i.h.bf16 %v1114_v63  ;;  %v1115_v6 = vunpack.i.l.bf16 %v1114_v63 }
  0x98   :  { %969 = vmatprep.subr.msk.bf16.mxu0 %vm1534_vm10, %v967_v60 }
  0x99   :  { %v291_v7 = vsel %vm108_vm0, %v1120_v62, %v1121_v61  ;;  %v279_v8 = vsel %vm95_vm3, %v1115_v6, %v1116_v4 }
  0x9a   :  { %v1129_v9 = vpop.permute.xlu1 %1128  ;;  %v991_v10 = vpack.c.bf16 %v291_v7, %v279_v8  ;;  %v1124_v14 = vpop.permute.xlu0 %1123 }
  0x9b   :  { %v1131_v12 = vunpack.i.h.bf16 %v1129_v9  ;;  %v1130_v13 = vunpack.i.l.bf16 %v1129_v9  ;;  %v1126_v17 = vunpack.i.h.bf16 %v1124_v14  ;;  %v1125_v18 = vunpack.i.l.bf16 %v1124_v14 }
  0x9c   :  { %993 = vmatprep.subr.msk.bf16.mxu1 %vm1534_vm10, %v991_v10 }
  0x9d   :  { %v109_v19 = vsel %vm108_vm0, %v1130_v13, %v1110_v50  ;;  %v290_v20 = vsel %vm108_vm0, %v1131_v12, %v1120_v62  ;;  %v96_v21 = vsel %vm95_vm3, %v1125_v18, %v1105_v55  ;;  %v278_v22 = vsel %vm95_vm3, %v1126_v17, %v1115_v6 }
  0x9e   :  { %v1139_v24 = vpop.permute.xlu1 %1138  ;;  %v970_v15 = vpack.c.bf16 %v109_v19, %v96_v21  ;;  %v994_v25 = vpack.c.bf16 %v290_v20, %v278_v22  ;;  %v1134_v29 = vpop.permute.xlu0 %1133 }
  0x9f   :  { %v1141_v26 = vunpack.i.h.bf16 %v1139_v24  ;;  %v1140_v27 = vunpack.i.l.bf16 %v1139_v24  ;;  %v1136_v30 = vunpack.i.h.bf16 %v1134_v29  ;;  %v1135_v31 = vunpack.i.l.bf16 %v1134_v29 }
  0xa0   :  { %972 = vmatpush1.bf16.msk.msra.mxu0 %vm1558_vm13, %v970_v15  ;;  %996 = vmatpush1.bf16.msk.msra.mxu1 %vm1558_vm13, %v994_v25 }
  0xa1   :  { %v304_v32 = vsel %vm122_vm12, %v1140_v27, %v1141_v26  ;;  %v124_v34 = vsel %vm122_vm12, %v1135_v31, %v1136_v30 }
  0xa2   :  { %v997_v33 = vpack.c.bf16 %v304_v32, %v1427_v2  ;;  %v1149_v35 = vpop.permute.xlu1 %1148  ;;  %v973_v36 = vpack.c.bf16 %v124_v34, %v1439_v5  ;;  %v1144_v37 = vpop.permute.xlu0 %1143  ;;  %v60_v32 = vld [vmem:[#allocation3] sm:$0xff] }
  0xa3   :  { %v1146_v38 = vunpack.i.h.bf16 %v1144_v37  ;;  %v1145_v40 = vunpack.i.l.bf16 %v1144_v37  ;;  %v1151_v41 = vunpack.i.h.bf16 %v1149_v35  ;;  %v1150_v42 = vunpack.i.l.bf16 %v1149_v35 }
  0xa4   :  { %999 = vmatprep.subr.msk.bf16.mxu1 %vm1570_vm14, %v997_v33  ;;  %975 = vmatprep.subr.msk.bf16.mxu0 %vm1570_vm14, %v973_v36 }
  0xa5   :  { %v303_v43 = vsel %vm122_vm12, %v1146_v38, %v1140_v27  ;;  %v123_v44 = vsel %vm122_vm12, %v1145_v40, %v1135_v31  ;;  %v137_v53 = vsel %vm1814_vm4, %v1150_v42, %v1151_v41 }
  0xa6   :  { %v1159_v45 = vpop.permute.xlu1 %1158  ;;  %v1000_v48 = vpack.c.bf16 %v303_v43, %v1422_v1  ;;  %v976_v49 = vpack.c.bf16 %v123_v44, %v1432_v3  ;;  %v1154_v50 = vpop.permute.xlu0 %1153 }
  0xa7   :  { %v1156_v51 = vunpack.i.h.bf16 %v1154_v50  ;;  %v1155_v52 = vunpack.i.l.bf16 %v1154_v50  ;;  %v1161_v54 = vunpack.i.h.bf16 %v1159_v45  ;;  %v1160_v55 = vunpack.i.l.bf16 %v1159_v45 }
  0xa8   :  { %978 = vmatpush1.bf16.msk.msra.mxu0 %vm1586_vm15, %v976_v49  ;;  %1002 = vmatpush1.bf16.msk.msra.mxu1 %vm1586_vm15, %v1000_v48 }
  0xa9   :  { %v174_v56 = vsel %vm172_vm5, %v1155_v52, %v1156_v51  ;;  %v316_v63 = vsel %vm1814_vm4, %v1160_v55, %v1161_v54 }
  0xaa   :  { %v1169_v57 = vpop.permute.xlu1 %1168  ;;  %v979_v58 = vpack.c.bf16 %v174_v56, %v137_v53  ;;  %v1164_v60 = vpop.permute.xlu0 %1163 }
  0xab   :  { %v1166_v61 = vunpack.i.h.bf16 %v1164_v60  ;;  %v1165_v62 = vunpack.i.l.bf16 %v1164_v60  ;;  %v1171_v4 = vunpack.i.h.bf16 %v1169_v57  ;;  %v1170_v6 = vunpack.i.l.bf16 %v1169_v57 }
  0xac   :  { %981 = vmatprep.subr.msk.bf16.mxu0 %vm1504_vm8, %v979_v58  ;;  %v1357_v57 = vmov 0   ;;  %v452_v58 = vld [vmem:[%s1810_s4] sm:$0xff] }
  0xad   :  { %v350_v7 = vsel %vm172_vm5, %v1165_v62, %v1166_v61  ;;  %v136_v14 = vsel %vm1814_vm4, %v1170_v6, %v1150_v42  ;;  %v315_v17 = vsel %vm1814_vm4, %v1171_v4, %v1160_v55  ;;  %vm177_vm4 = vcmask 588800   ;;  %1182 = vset.pattern.permute.xlu1 %v1357_v57  ;;  %1183 = vset.pattern.permute.xlu0 %v1357_v57  ;;  %v448_v6 = vld [vmem:[%s1809_s3] sm:$0xff] }
  0xae   :  { %v145_v8 = vpop.permute.xlu1 %144  ;;  %v1003_v9 = vpack.c.bf16 %v350_v7, %v316_v63  ;;  %v1174_v10 = vpop.permute.xlu0 %1173 }
  0xaf   :  { %v1176_v12 = vunpack.i.h.bf16 %v1174_v10  ;;  %v1175_v13 = vunpack.i.l.bf16 %v1174_v10 }
  0xb0   :  { %1005 = vmatprep.subr.msk.bf16.mxu1 %vm1504_vm8, %v1003_v9 }
  0xb1   :  { %v173_v18 = vsel %vm172_vm5, %v1175_v13, %v1155_v52  ;;  %v349_v19 = vsel %vm172_vm5, %v1176_v12, %v1165_v62 }
  0xb2   :  { %v324_v20 = vpop.permute.xlu1 %323  ;;  %v982_v21 = vpack.c.bf16 %v173_v18, %v136_v14  ;;  %v1006_v22 = vpack.c.bf16 %v349_v19, %v315_v17  ;;  %v1179_v24 = vpop.permute.xlu0 %1178 }
  0xb3   :  { %v1181_v15 = vunpack.i.h.bf16 %v1179_v24  ;;  %v1180_v25 = vunpack.i.l.bf16 %v1179_v24 }
  0xb4   :  { %984 = vmatpush1.bf16.msk.msra.mxu0 %vm1516_vm9, %v982_v21  ;;  %1008 = vmatpush1.bf16.msk.msra.mxu1 %vm1516_vm9, %v1006_v22 }
  0xb5   :  { %v150_v27 = vsel %vm148_vm7, %v145_v8, %v1180_v25  ;;  %v328_v29 = vsel %vm148_vm7, %v324_v20, %v1181_v15 }
  0xb6   :  { %v322_v26 = vpop.permute.xlu1 %321  ;;  %v143_v31 = vpop.permute.xlu0 %142  ;;  %917 = vmatprep.subr.msk.mxu0 %vm1494_vm6, %v150_v27  ;;  %930 = vmatprep.subr.msk.mxu1 %vm1494_vm6, %v328_v29 }
  0xb7   :  { %v327_v30 = vsel %vm148_vm7, %v322_v26, %v324_v20  ;;  %v149_v33 = vsel %vm148_vm7, %v143_v31, %v145_v8 }
  0xb8   :  { %918 = vmatpush1.msk.msra.mxu0 %vm1544_vm11, %v149_v33  ;;  %931 = vmatpush1.msk.msra.mxu1 %vm1544_vm11, %v327_v30 }
  0xb9   :  { %919 = vmatmul.mubr.msk.f32.vlgmr.msra.gmra.mrb[0].mxu0 %vm177_vm4, %v60_v32  ;;  %932 = vmatmul.mubr.msk.f32.vlgmr.msra.gmra.mrb[0].mxu1 %vm177_vm4, %v60_v32 }
  0xba   :  { %647 = vmatprep.mubr.f32.mxu0 %v1347_v0  ;;  %818 = vmatprep.mubr.f32.mxu1 %v1347_v0 }
 0x18c   :  { %v247_v34 = vpop.f32.mrb[0].mxu0  ;;  %v419_v35 = vpop.f32.mrb[0].mxu1 }
 0x18d   :  { %v249_v36 = vpop.f32.mrb[1].mxu0  ;;  %v421_v37 = vpop.f32.mrb[1].mxu1 }
 0x18e   :  { %v427_v38 = vadd.f32 %v421_v37, %v419_v35  ;;  %v424_v40 = vadd.f32 %v249_v36, %v247_v34 }
 0x190   :  { %428 = vadd.xlane.f32.xlu1 %v427_v38  ;;  %425 = vadd.xlane.f32.xlu0 %v424_v40 }
 0x21d   :  { %v429_v41 = vpop.xlane.xlu1 %428  ;;  %v426_v42 = vpop.xlane.xlu0 %425 }
 0x21e   :  { %v430_v43 = vadd.f32 %v429_v41, %v426_v42 }
 0x220   :  { %v431_v44 = vmul.f32 0.001953125, %v430_v43 }
 0x222   :  { %v432_v45 = vsub.f32 %v247_v34, %v431_v44  ;;  %v433_v48 = vsub.f32 %v249_v36, %v431_v44  ;;  %v434_v49 = vsub.f32 %v419_v35, %v431_v44  ;;  %v435_v50 = vsub.f32 %v421_v37, %v431_v44 }
 0x224   :  { %v436_v51 = vmul.f32 %v432_v45, %v432_v45  ;;  %v437_v52 = vmul.f32 %v433_v48, %v433_v48  ;;  %v441_v54 = vmul.f32 %v434_v49, %v434_v49  ;;  %v442_v55 = vmul.f32 %v435_v50, %v435_v50 }
 0x226   :  { %v438_v53 = vadd.f32 %v437_v52, %v436_v51  ;;  %v443_v56 = vadd.f32 %v442_v55, %v441_v54 }
 0x228   :  { %439 = vadd.xlane.f32.xlu0 %v438_v53 }
 0x22c   :  { %444 = vadd.xlane.f32.xlu0 %v443_v56 }
 0x242   :  { %462 = vperm.xlu0 %1183, %v452_v58  }
 0x246   :  { %1195 = vrot.lane.b32.xlu0 %v1347_v0, %s1351_s23 }
 0x2b5   :  { %v440_v60 = vpop.xlane.xlu0 %439 }
 0x2b9   :  { %v445_v61 = vpop.xlane.xlu0 %444 }
 0x2ba   :  { %v446_v62 = vadd.f32 %v445_v61, %v440_v60 }
 0x2bc   :  { %v447_v63 = vmul.f32 0.001953125, %v446_v62 }
 0x2be   :  { %v449_v4 = vadd.f32 1e-05, %v447_v63 }
 0x2c0   :  { %1294 = vrsqrt.f32 %v449_v4 }
 0x2c1   :  { %v463_v10 = vpop.permute.xlu0 %462 }
 0x2c5   :  { %v1689_v34 = vpop.permute.xlu0 %1195 }
 0x2ca   :  { %v1295_v7 = vpop.eup %1294 }
 0x2cb   :  { %v451_v8 = vmul.f32 %v1295_v7, %v448_v6 }
 0x2cd   :  { %455 = vperm.xlu1 %1182, %v451_v8  }
 0x2d1   :  { %1185 = vrot.lane.b32.xlu1 %v1347_v0, %s1349_s14 }
 0x2d5   :  { %1190 = vrot.lane.b32.xlu1 %v1347_v0, %s1348_s13 }
 0x2d9   :  { %1200 = vrot.lane.b32.xlu1 %v1347_v0, %s1350_s22 }
 0x34c   :  { %v456_v9 = vpop.permute.xlu1 %455 }
 0x34d   :  { %v458_v12 = vmul.f32 %v456_v9, %v432_v45  ;;  %v459_v13 = vmul.f32 %v456_v9, %v433_v48  ;;  %v467_v14 = vmul.f32 %v456_v9, %v434_v49  ;;  %v468_v17 = vmul.f32 %v456_v9, %v435_v50 }
 0x34f   :  { %v465_v18 = vadd.f32 %v463_v10, %v458_v12  ;;  %v466_v19 = vadd.f32 %v463_v10, %v459_v13  ;;  %v469_v20 = vadd.f32 %v467_v14, %v463_v10  ;;  %v470_v21 = vadd.f32 %v468_v17, %v463_v10 }
 0x350   :  { %v1197_v17 = vunpack.i.l.bf16 %v1689_v34 }
 0x351   :  { %v1642_v22 = vmax.f32 %v465_v18, 0.0  ;;  %v1644_v24 = vmax.f32 %v466_v19, 0.0  ;;  %v1646_v15 = vmax.f32 %v469_v20, 0.0  ;;  %v1648_v25 = vmax.f32 %v470_v21, 0.0 }
 0x353   :  { %v1204_v26 = vpack.i.bf16 %v1644_v24, %v1642_v22  ;;  %v1234_v27 = vpack.i.bf16 %v1648_v25, %v1646_v15  ;;  %v1244_v29 = vpack.i.bf16 %v1347_v0, %v1644_v24  ;;  %v1254_v30 = vpack.i.bf16 %v1646_v15, %v1642_v22 }
 0x354   :  { %v1274_v31 = vpack.i.bf16 %v1347_v0, %v1648_v25 }
 0x355   :  { %1205 = vrot.lane.b32.xlu1 %v1204_v26, %s1349_s14  ;;  %1235 = vrot.lane.b32.xlu0 %v1234_v27, %s1351_s23 }
 0x359   :  { %1210 = vrot.lane.b32.xlu1 %v1204_v26, %s1348_s13  ;;  %1245 = vrot.lane.b32.xlu0 %v1244_v29, %s1352_s0 }
 0x35d   :  { %1255 = vrot.lane.b32.xlu0 %v1254_v30, %s1352_s0  ;;  %1215 = vrot.lane.b32.xlu1 %v1234_v27, %s1349_s14 }
 0x361   :  { %1265 = vrot.lane.b32.xlu0 %v1244_v29, %s1354_s25  ;;  %1220 = vrot.lane.b32.xlu1 %v1234_v27, %s1348_s13 }
 0x365   :  { %1275 = vrot.lane.b32.xlu0 %v1274_v31, %s1354_s25  ;;  %1225 = vrot.lane.b32.xlu1 %v1204_v26, %s1351_s23 }
 0x369   :  { %1285 = vrot.lane.b32.xlu0 %v1254_v30, %s1354_s25  ;;  %1230 = vrot.lane.b32.xlu1 %v1204_v26, %s1350_s22  ;;  %v1198_v26 = vunpack.i.h.bf16 %v1689_v34 }
 0x36d   :  { %1290 = vrot.lane.b32.xlu0 %v1347_v0, %s1355_s26  ;;  %1240 = vrot.lane.b32.xlu1 %v1234_v27, %s1350_s22  ;;  %v1186_v0 = vpop.permute.xlu1 %1185 }
 0x36e   :  { %v1187_v41 = vunpack.i.l.bf16 %v1186_v0  ;;  %v1188_v58 = vunpack.i.h.bf16 %v1186_v0 }
 0x371   :  { %548 = vrot.lane.b32.xlu0 %v1642_v22, %s1355_s26  ;;  %1250 = vrot.lane.b32.xlu1 %v1274_v31, %s1352_s0  ;;  %v1191_v32 = vpop.permute.xlu1 %1190 }
 0x372   :  { %v1192_v42 = vunpack.i.l.bf16 %v1191_v32  ;;  %v1193_v60 = vunpack.i.h.bf16 %v1191_v32 }
 0x375   :  { %1260 = vrot.lane.b32.xlu1 %v1244_v29, %s1353_s24  ;;  %v1687_v33 = vpop.permute.xlu1 %1200 }
 0x376   :  { %v1202_v21 = vunpack.i.l.bf16 %v1687_v33 }
 0x379   :  { %1270 = vrot.lane.b32.xlu1 %v1274_v31, %s1353_s24 }
 0x37d   :  { %1280 = vrot.lane.b32.xlu1 %v1254_v30, %s1353_s24 }
 0x381   :  { %550 = vrot.lane.b32.xlu1 %v1644_v24, %s1355_s26 }
 0x385   :  { %724 = vrot.lane.b32.xlu1 %v1648_v25, %s1355_s26 }
 0x389   :  { %722 = vrot.lane.b32.xlu1 %v1646_v15, %s1355_s26 }
 0x3c7   :  { %v1206_v35 = vpop.permute.xlu1 %1205  ;;  %v1691_v38 = vpop.permute.xlu0 %1235 }
 0x3c8   :  { %v1208_v36 = vunpack.i.h.bf16 %v1206_v35  ;;  %v1207_v37 = vunpack.i.l.bf16 %v1206_v35  ;;  %v1238_v30 = vunpack.i.h.bf16 %v1691_v38  ;;  %v1237_v31 = vunpack.i.l.bf16 %v1691_v38 }
 0x3ca   :  { %v493_v45 = vsel %vm78_vm1, %v1187_v41, %v1207_v37  ;;  %v494_v48 = vsel %vm78_vm1, %v1207_v37, %v1208_v36 }
 0x3cb   :  { %v1211_v40 = vpop.permute.xlu1 %1210  ;;  %v1246_v54 = vpop.permute.xlu0 %1245 }
 0x3cc   :  { %v1213_v43 = vunpack.i.h.bf16 %v1211_v40  ;;  %v1212_v44 = vunpack.i.l.bf16 %v1211_v40  ;;  %v1248_v13 = vunpack.i.h.bf16 %v1246_v54  ;;  %v1247_v14 = vunpack.i.l.bf16 %v1246_v54 }
 0x3ce   :  { %v566_v49 = vsel %vm161_vm2, %v1192_v42, %v1212_v44  ;;  %v567_v50 = vsel %vm161_vm2, %v1212_v44, %v1213_v43  ;;  %v531_v0 = vsel %vm122_vm12, %v1247_v14, %v1248_v13  ;;  %v1203_v44 = vunpack.i.h.bf16 %v1687_v33 }
 0x3cf   :  { %v1009_v51 = vpack.c.bf16 %v567_v50, %v494_v48  ;;  %v1012_v52 = vpack.c.bf16 %v566_v49, %v493_v45  ;;  %v1216_v53 = vpop.permute.xlu1 %1215  ;;  %v1256_v8 = vpop.permute.xlu0 %1255  ;;  %v1021_v48 = vpack.c.bf16 %v531_v0, %v1644_v24  ;;  %v679_v50 = vsel %vm95_vm3, %v1198_v26, %v1237_v31 }
 0x3d0   :  { %v1218_v55 = vunpack.i.h.bf16 %v1216_v53  ;;  %v1217_v56 = vunpack.i.l.bf16 %v1216_v53  ;;  %v1257_v32 = vunpack.i.l.bf16 %v1256_v8 }
 0x3d1   :  { %1011 = vmatprep.subr.msk.bf16.mxu0 %vm1504_vm8, %v1009_v51  ;;  %v680_v51 = vsel %vm95_vm3, %v1237_v31, %v1238_v30 }
 0x3d2   :  { %1014 = vmatpush1.bf16.msk.msra.mxu0 %vm1516_vm9, %v1012_v52  ;;  %v667_v63 = vsel %vm78_vm1, %v1188_v58, %v1217_v56  ;;  %v668_v4 = vsel %vm78_vm1, %v1217_v56, %v1218_v55  ;;  %v530_v49 = vsel %vm122_vm12, %v1257_v32, %v1247_v14  ;;  %v1258_v56 = vunpack.i.h.bf16 %v1256_v8 }
 0x3d3   :  { %v1221_v57 = vpop.permute.xlu1 %1220  ;;  %v1715_v35 = vpop.permute.xlu0 %1265 }
 0x3d4   :  { %v1223_v61 = vunpack.i.h.bf16 %v1221_v57  ;;  %v1222_v62 = vunpack.i.l.bf16 %v1221_v57  ;;  %v1024_v57 = vpack.c.bf16 %v530_v49, %v1642_v22 }
 0x3d6   :  { %v740_v6 = vsel %vm161_vm2, %v1193_v60, %v1222_v62  ;;  %v741_v7 = vsel %vm161_vm2, %v1222_v62, %v1223_v61  ;;  %v1268_v61 = vunpack.i.h.bf16 %v1715_v35  ;;  %v1267_v62 = vunpack.i.l.bf16 %v1715_v35 }
 0x3d7   :  { %v1033_v9 = vpack.c.bf16 %v741_v7, %v668_v4  ;;  %v1036_v10 = vpack.c.bf16 %v740_v6, %v667_v63  ;;  %v1226_v12 = vpop.permute.xlu1 %1225  ;;  %v1276_v33 = vpop.permute.xlu0 %1275 }
 0x3d8   :  { %v1228_v18 = vunpack.i.h.bf16 %v1226_v12  ;;  %v1227_v19 = vunpack.i.l.bf16 %v1226_v12  ;;  %v1278_v12 = vunpack.i.h.bf16 %v1276_v33  ;;  %v1277_v13 = vunpack.i.l.bf16 %v1276_v33 }
 0x3d9   :  { %1035 = vmatprep.subr.msk.bf16.mxu1 %vm1504_vm8, %v1033_v9 }
 0x3da   :  { %1038 = vmatpush1.bf16.msk.msra.mxu1 %vm1516_vm9, %v1036_v10  ;;  %v505_v36 = vsel %vm95_vm3, %v1197_v17, %v1227_v19  ;;  %v506_v37 = vsel %vm95_vm3, %v1227_v19, %v1228_v18  ;;  %v577_v10 = vsel %vm172_vm5, %v1267_v62, %v1268_v61  ;;  %v751_v18 = vsel %vm172_vm5, %v1277_v13, %v1278_v12 }
 0x3db   :  { %v1231_v20 = vpop.permute.xlu1 %1230  ;;  %v1286_v9 = vpop.permute.xlu0 %1285 }
 0x3dc   :  { %v1233_v27 = vunpack.i.h.bf16 %v1231_v20  ;;  %v1232_v29 = vunpack.i.l.bf16 %v1231_v20  ;;  %v1288_v23 = vunpack.i.h.bf16 %v1286_v9  ;;  %v1287_v19 = vunpack.i.l.bf16 %v1286_v9 }
 0x3de   :  { %v517_v40 = vsel %vm108_vm0, %v1202_v21, %v1232_v29  ;;  %v518_v41 = vsel %vm108_vm0, %v1232_v29, %v1233_v27  ;;  %v576_v31 = vsel %vm172_vm5, %v1287_v19, %v1267_v62  ;;  %v750_v0 = vsel %vm172_vm5, %v1288_v23, %v1277_v13 }
 0x3df   :  { %v1015_v34 = vpack.c.bf16 %v518_v41, %v506_v37  ;;  %v1018_v42 = vpack.c.bf16 %v517_v40, %v505_v36  ;;  %v1241_v43 = vpop.permute.xlu1 %1240  ;;  %v1291_v21 = vpop.permute.xlu0 %1290 }
 0x3e0   :  { %v1243_v45 = vunpack.i.h.bf16 %v1241_v43  ;;  %v1242_v38 = vunpack.i.l.bf16 %v1241_v43  ;;  %v1292_v29 = vunpack.i.l.bf16 %v1291_v21  ;;  %v1293_v41 = vunpack.i.h.bf16 %v1291_v21  ;;  %v479_v43 = vld [vmem:[%s1808_s2] sm:$0xff] }
 0x3e1   :  { %1017 = vmatprep.subr.msk.bf16.mxu0 %vm1534_vm10, %v1015_v34 }
 0x3e2   :  { %v691_v52 = vsel %vm108_vm0, %v1203_v44, %v1242_v38  ;;  %v692_v53 = vsel %vm108_vm0, %v1242_v38, %v1243_v45  ;;  %1020 = vmatpush1.bf16.msk.msra.mxu0 %vm1558_vm13, %v1018_v42  ;;  %vm1835_vm0 = vcmask 678912  }
 0x3e3   :  { %v1039_v54 = vpack.c.bf16 %v692_v53, %v680_v51  ;;  %v1042_v55 = vpack.c.bf16 %v691_v52, %v679_v50  ;;  %v1251_v24 = vpop.permute.xlu1 %1250  ;;  %1023 = vmatprep.subr.msk.bf16.mxu0 %vm1570_vm14, %v1021_v48  ;;  %vm1836_vm1 = vmmov %vm1835_vm0  ;;  %v549_v39 = vpop.permute.xlu0 %548 }
 0x3e4   :  { %v1253_v58 = vunpack.i.h.bf16 %v1251_v24  ;;  %v1252_v60 = vunpack.i.l.bf16 %v1251_v24  ;;  %vm1837_vm2 = vmmov %vm1835_vm0 }
 0x3e5   :  { %1041 = vmatprep.subr.msk.bf16.mxu1 %vm1534_vm10, %v1039_v54  ;;  %vm1838_vm3 = vmmov %vm1835_vm0 }
 0x3e6   :  { %v704_v63 = vsel %vm122_vm12, %v1258_v56, %v1252_v60  ;;  %v705_v4 = vsel %vm122_vm12, %v1252_v60, %v1253_v58  ;;  %1026 = vmatpush1.bf16.msk.msra.mxu0 %vm1586_vm15, %v1024_v57  ;;  %1044 = vmatpush1.bf16.msk.msra.mxu1 %vm1558_vm13, %v1042_v55 }
 0x3e7   :  { %v1045_v22 = vpack.c.bf16 %v705_v4, %v1648_v25  ;;  %v1048_v6 = vpack.c.bf16 %v704_v63, %v1646_v15  ;;  %v1261_v59 = vpop.permute.xlu1 %1260 }
 0x3e8   :  { %v1263_v7 = vunpack.i.h.bf16 %v1261_v59  ;;  %v1262_v8 = vunpack.i.l.bf16 %v1261_v59 }
 0x3e9   :  { %1047 = vmatprep.subr.msk.bf16.mxu1 %vm1570_vm14, %v1045_v22  ;;  %v853_v22 = vld [vmem:[%s1812_s6] sm:$0xff]  ;;  %s1358_s6 = smov [#allocation6]  }
 0x3ea   :  { %v543_v14 = vsel %vm1835_vm0, %v1262_v8, %v1263_v7  ;;  %1050 = vmatpush1.bf16.msk.msra.mxu1 %vm1586_vm15, %v1048_v6  ;;  %s895_s11 = sshll.u32 %s1358_s6, 4  ;;  %s896_s11 = int_to_ptr.vmem [resolvable:$true] %s895_s11 }
 0x3eb   :  { %v1027_v11 = vpack.c.bf16 %v577_v10, %v543_v14  ;;  %v1271_v25 = vpop.permute.xlu1 %1270  ;;  %v849_v10 = vld [vmem:[%s1811_s5] sm:$0xff]  ;;  %s1320_s5 = scalar_lea.vmem %s896_s11, 512  ;;  %p1325_p9 = scmp.lt.s32.totalorder %s896_s11, %s896_s11 }
 0x3ec   :  { %v1273_v17 = vunpack.i.h.bf16 %v1271_v25  ;;  %v1272_v15 = vunpack.i.l.bf16 %v1271_v25  ;;  %p1321_p8 = scmp.ne.s32.totalorder %s896_s11, %s1320_s5  ;;  %p1326_p10 = scmp.lt.s32.totalorder %s1320_s5, %s1320_s5 }
 0x3ed   :  { %1029 = vmatprep.subr.msk.bf16.mxu0 %vm1504_vm8, %v1027_v11 }
 0x3ee   :  { %v717_v20 = vsel %vm1836_vm1, %v1272_v15, %v1273_v17  ;;  %p1327_p11 = por %p1326_p10, %p1325_p9 }
 0x3ef   :  { %v1051_v26 = vpack.c.bf16 %v751_v18, %v717_v20  ;;  %v1281_v27 = vpop.permute.xlu1 %1280 }
 0x3f0   :  { %v1283_v30 = vunpack.i.h.bf16 %v1281_v27  ;;  %v1282_v46 = vunpack.i.l.bf16 %v1281_v27  ;;  %p1328_p12 = pnand %p1327_p11, %p1321_p8 }
 0x3f1   :  { %1053 = vmatprep.subr.msk.bf16.mxu1 %vm1504_vm8, %v1051_v26 }
 0x3f2   :  { %v542_v32 = vsel %vm1837_vm2, %v1282_v46, %v1262_v8  ;;  %v716_v35 = vsel %vm1838_vm3, %v1283_v30, %v1272_v15 }
 0x3f3   :  { %v1030_v36 = vpack.c.bf16 %v576_v31, %v542_v32  ;;  %v1054_v37 = vpack.c.bf16 %v750_v0, %v716_v35  ;;  %v551_v40 = vpop.permute.xlu1 %550 }
 0x3f4   :  { %v555_v34 = vsel %vm148_vm7, %v551_v40, %v1292_v29  ;;  %v554_v44 = vsel %vm148_vm7, %v549_v39, %v551_v40 }
 0x3f5   :  { %1032 = vmatpush1.bf16.msk.msra.mxu0 %vm1516_vm9, %v1030_v36  ;;  %1056 = vmatpush1.bf16.msk.msra.mxu1 %vm1516_vm9, %v1054_v37 }
 0x3f6   :  { %943 = vmatprep.subr.msk.mxu0 %vm1494_vm6, %v555_v34 }
 0x3f7   :  { %v725_v42 = vpop.permute.xlu1 %724 }
 0x3f8   :  { %v729_v45 = vsel %vm148_vm7, %v725_v42, %v1293_v41 }
 0x3f9   :  { %944 = vmatpush1.msk.msra.mxu0 %vm1544_vm11, %v554_v44  ;;  %956 = vmatprep.subr.msk.mxu1 %vm1494_vm6, %v729_v45 }
 0x3fa   :  { %945 = vmatmul.mubr.msk.f32.vlgmr.msra.gmra.mrb[2].mxu0 %vm177_vm4, %v479_v43 }
 0x3fb   :  { %v723_v47 = vpop.permute.xlu1 %722 }
 0x3fc   :  { %v728_v38 = vsel %vm148_vm7, %v723_v47, %v725_v42 }
 0x3fd   :  { %957 = vmatpush1.msk.msra.mxu1 %vm1544_vm11, %v728_v38 }
 0x3fe   :  { %958 = vmatmul.mubr.msk.f32.vlgmr.msra.gmra.mrb[2].mxu1 %vm177_vm4, %v479_v43 }
 0x4cd   :  { %v649_v48 = vpop.f32.mrb[2].mxu0 }
 0x4ce   :  { %v651_v49 = vpop.f32.mrb[3].mxu0 }
 0x4cf   :  { %v825_v50 = vadd.f32 %v651_v49, %v649_v48 }
 0x4d1   :  { %v820_v51 = vpop.f32.mrb[2].mxu1  ;;  %826 = vadd.xlane.f32.xlu0 %v825_v50 }
 0x4d2   :  { %v822_v52 = vpop.f32.mrb[3].mxu1 }
 0x4d3   :  { %v828_v53 = vadd.f32 %v822_v52, %v820_v51 }
 0x4d5   :  { %829 = vadd.xlane.f32.xlu1 %v828_v53 }
 0x55e   :  { %v827_v28 = vpop.xlane.xlu0 %826 }
 0x562   :  { %v830_v33 = vpop.xlane.xlu1 %829 }
 0x563   :  { %v831_v54 = vadd.f32 %v830_v33, %v827_v28 }
 0x565   :  { %v832_v55 = vmul.f32 0.001953125, %v831_v54 }
 0x567   :  { %v833_v24 = vsub.f32 %v649_v48, %v832_v55  ;;  %v834_v56 = vsub.f32 %v651_v49, %v832_v55  ;;  %v835_v57 = vsub.f32 %v820_v51, %v832_v55  ;;  %v836_v58 = vsub.f32 %v822_v52, %v832_v55 }
 0x569   :  { %v837_v16 = vmul.f32 %v833_v24, %v833_v24  ;;  %v838_v60 = vmul.f32 %v834_v56, %v834_v56  ;;  %v842_v62 = vmul.f32 %v835_v57, %v835_v57  ;;  %v843_v63 = vmul.f32 %v836_v58, %v836_v58 }
 0x56b   :  { %v839_v61 = vadd.f32 %v838_v60, %v837_v16  ;;  %v844_v4 = vadd.f32 %v843_v63, %v842_v62 }
 0x56d   :  { %840 = vadd.xlane.f32.xlu0 %v839_v61 }
 0x571   :  { %845 = vadd.xlane.f32.xlu0 %v844_v4 }
 0x587   :  { %863 = vperm.xlu0 %1183, %v853_v22  }
 0x5fa   :  { %v841_v6 = vpop.xlane.xlu0 %840 }
 0x5fe   :  { %v846_v59 = vpop.xlane.xlu0 %845 }
 0x5ff   :  { %v847_v7 = vadd.f32 %v846_v59, %v841_v6 }
 0x601   :  { %v848_v8 = vmul.f32 0.001953125, %v847_v7 }
 0x603   :  { %v850_v9 = vadd.f32 1e-05, %v848_v8 }
 0x605   :  { %1296 = vrsqrt.f32 %v850_v9 }
 0x606   :  { %v864_v18 = vpop.permute.xlu0 %863 }
 0x60f   :  { %v1297_v12 = vpop.eup %1296 }
 0x610   :  { %v852_v13 = vmul.f32 %v1297_v12, %v849_v10 }
 0x612   :  { %856 = vperm.xlu1 %1182, %v852_v13  }
 0x691   :  { %v857_v14 = vpop.permute.xlu1 %856 }
 0x692   :  { %v859_v11 = vmul.f32 %v857_v14, %v833_v24  ;;  %v860_v25 = vmul.f32 %v857_v14, %v834_v56  ;;  %v868_v17 = vmul.f32 %v857_v14, %v835_v57  ;;  %v869_v15 = vmul.f32 %v857_v14, %v836_v58 }
 0x694   :  { %v866_v23 = vadd.f32 %v864_v18, %v859_v11  ;;  %v867_v19 = vadd.f32 %v864_v18, %v860_v25  ;;  %v870_v20 = vadd.f32 %v868_v17, %v864_v18  ;;  %v871_v21 = vadd.f32 %v869_v15, %v864_v18 }
 0x696   :  { %v874_v26 = vadd.f32 %v866_v23, %v1432_v3  ;;  %v875_v27 = vadd.f32 %v867_v19, %v1439_v5  ;;  %v883_v29 = vadd.f32 %v870_v20, %v1422_v1  ;;  %v884_v30 = vadd.f32 %v871_v21, %v1427_v2 }
 0x698   :  { %v876_v46 = vmax.f32 %v874_v26, 0.0  ;;  %v877_v31 = vmax.f32 %v875_v27, 0.0  ;;  %v885_v0 = vmax.f32 %v883_v29, 0.0  ;;  %v886_v32 = vmax.f32 %v884_v30, 0.0 }
 0x69a   :  { %878 = vst [vmem:[#allocation6] sm:$0xff] %v876_v46  ;;  %879 = vst [vmem:[#allocation6 + $0x8] sm:$0xff] %v877_v31 }
 0x69b   :  { %888 = vst [vmem:[#allocation6 + $0x10] sm:$0xff] %v885_v0  ;;  %889 = vst [vmem:[#allocation6 + $0x18] sm:$0xff] %v886_v32 }
 0x69c   :  { %1331 = shalt.err (!%p1328_p12)
}
 0x69d   :  { %s1332_s14 = scalar_lea.hbm %s1813_s7, 512 }
 0x69e   :  { %p1333_p13 = scmp.ne.s32.totalorder %s1813_s7, %s1332_s14  ;;  %p1336_p0 = scmp.lt.u32.totalorder %s1332_s14, %s1813_s7 }
 0x6a0   :  { %p1338_p1 = pnand %p1336_p0, %p1333_p13 }
 0x6a2   :  { %1341 = shalt.err (!%p1338_p1)
}
 0x6a3   :  { %s1359_s18 = smov 256   ;;  %s1360_s19 = smov 16  }
 0x6a4   :  { %901 = dma.vmem_to_hbm [thread:$0]  %s896_s11, 512, %s1813_s7, [#allocation5], %s1359_s18, %s1359_s18, %s1360_s19  }
 0x6a5   :  { %1344 = dma.done.wait [#allocation5], 512  }
 0x6a6   :  { %1345 = vsyncadd [#allocation5], 4294966784 }
 0x6a7   :  { %905 = vsyncpa [#allocation4], 1 }
 0x6a8   :  { %906 = vsyncpa [#allocation5], 1 }

</bundles_post_ra>
